<compile_context>
chip_gen: v5e
topology: v5e:2x2
jax: 0.10.0
libtpu: 0.0.40
codegen_flags: <defaults>
</compile_context>

<pallas_src>
import functools

import jax
import jax.numpy as jnp
from jax.experimental import pallas as pl
from jax.experimental.pallas import tpu as pltpu

d_model = 256
d_ff = 256
LN_EPS = 1e-5


def _round_up(x, m):
    return ((x + m - 1) // m) * m


def _ffn_ln_kernel(x_ref, w1_ref, w2_ref, o_ref):
    # x_ref:  (tm, d_model) native dtype   current token tile
    # w1_ref: (d_model, d_ff) bf16 full weight (transposed torch Linear)
    # w2_ref: (d_ff, d_model) bf16 full weight (transposed torch Linear)
    x_in = x_ref[...]
    xf = x_in.astype(jnp.float32)        # f32 copy for residual + LayerNorm

    # fc1 + ReLU: bf16 MXU operands, f32 accumulation; ReLU in f32 (VPU).
    h = jnp.dot(x_in.astype(jnp.bfloat16), w1_ref[...],
                preferred_element_type=jnp.float32)
    h = jnp.maximum(h, 0.0)

    # fc2 + residual (residual uses the f32 upcast of the original x).
    y = jnp.dot(h.astype(jnp.bfloat16), w2_ref[...],
                preferred_element_type=jnp.float32) + xf

    # LayerNorm over the feature (lane) axis: gamma=1, beta=0, biased var.
    mean = jnp.mean(y, axis=-1, keepdims=True)
    centered = y - mean
    var = jnp.mean(centered * centered, axis=-1, keepdims=True)
    o_ref[...] = (centered * jax.lax.rsqrt(var + LN_EPS)).astype(o_ref.dtype)


@functools.partial(jax.jit, static_argnames=("tile_m",))
def poswise_ffn(x, w1_t, w2_t, *, tile_m=2048):
    """x: [B, S, d_model]; w1_t: [d_model, d_ff]; w2_t: [d_ff, d_model]."""
    B, S, D = x.shape
    assert D == d_model
    M = B * S

    # Native-dtype token stream (no wrapper-side f32 cast / HBM pass).
    x2d = x.reshape(M, D)

    # Pre-cast weights once to the dtype the MXU consumes (no per-step casts).
    w1_bf = w1_t.astype(jnp.bfloat16)
    w2_bf = w2_t.astype(jnp.bfloat16)

    # Large tile to amortize ~0.35us/step pipeline overhead, but capped so the
    # grid has ~8+ steps for mid-sized M (token axis shards across both TCs on
    # v7x).  Always a multiple of 8 (sublane constraint).
    tm = min(tile_m, max(8, _round_up(pl.cdiv(M, 8), 8)))
    grid_m = pl.cdiv(M, tm)   # ragged final tile; OOB stores are masked

    itemsize = jnp.dtype(x.dtype).itemsize
    cost = pl.CostEstimate(
        flops=4 * M * d_model * d_ff,                       # two MxDxD matmuls
        transcendentals=M,                                   # one rsqrt per row
        bytes_accessed=2 * M * D * itemsize                  # x in + out
        + (d_model * d_ff + d_ff * d_model) * 2,             # bf16 weights
    )

    out = pl.pallas_call(
        _ffn_ln_kernel,
        out_shape=jax.ShapeDtypeStruct((M, D), x.dtype),
        grid_spec=pltpu.PrefetchScalarGridSpec(
            num_scalar_prefetch=0,
            grid=(grid_m,),
            in_specs=[
                pl.BlockSpec((tm, D), lambda i: (i, 0)),            # x tile
                pl.BlockSpec((d_model, d_ff), lambda i: (0, 0),     # W1^T
                             pipeline_mode=pl.Buffered(1)),
                pl.BlockSpec((d_ff, d_model), lambda i: (0, 0),     # W2^T
                             pipeline_mode=pl.Buffered(1)),
            ],
            out_specs=pl.BlockSpec((tm, D), lambda i: (i, 0)),
        ),
        compiler_params=pltpu.CompilerParams(
            dimension_semantics=("parallel",)),
        cost_estimate=cost,
    )(x2d, w1_bf, w2_bf)

    return out.reshape(B, S, D)


def _reference(x, w1_t, w2_t):
    xf = x.astype(jnp.float32)
    h = jnp.maximum(xf @ w1_t, 0.0)
    y = h @ w2_t + xf
    mean = jnp.mean(y, axis=-1, keepdims=True)
    var = jnp.mean((y - mean) ** 2, axis=-1, keepdims=True)
    return (y - mean) * jax.lax.rsqrt(var + LN_EPS)


if __name__ == "__main__":
    key = jax.random.PRNGKey(0)
    k_x, k_w1, k_w2 = jax.random.split(key, 3)

    B, S = 2, 8
    x = jax.random.normal(k_x, (B, S, d_model), dtype=jnp.float32)

    # Deterministic synthetic weights; torch Linear stores (out, in), we keep
    # the transposed (in, out) layout so the kernel does plain x @ W.
    w1_t = (jax.random.normal(k_w1, (d_model, d_ff), dtype=jnp.float32)
            * (1.0 / jnp.sqrt(d_model)))
    w2_t = (jax.random.normal(k_w2, (d_ff, d_model), dtype=jnp.float32)
            * (1.0 / jnp.sqrt(d_ff)))

    out = jax.block_until_ready(poswise_ffn(x, w1_t, w2_t))
    ref = _reference(x, w1_t, w2_t)

    assert out.shape == (B, S, d_model)
    # bf16 MXU operands with f32 accumulation -> relaxed tolerance vs f32 ref.
    assert jnp.allclose(out.astype(jnp.float32), ref, atol=3e-2, rtol=3e-2)

    print("KERNEL_OK")
</pallas_src>

<mosaic_0001>
module attributes {stable_mosaic.version = 11 : i64} {
  func.func @_ffn_ln_kernel(%arg0: i32, %arg1: memref<8x256xf32, #tpu.memory_space<vmem>>, %arg2: memref<256x256xbf16, #tpu.memory_space<vmem>>, %arg3: memref<256x256xbf16, #tpu.memory_space<vmem>>, %arg4: memref<8x256xf32, #tpu.memory_space<vmem>>) attributes {dimension_semantics = [#tpu.dimension_semantics<parallel>], iteration_bounds = array<i64: 2>, scalar_prefetch = 0 : i64, scratch_operands = 0 : i64, tpu.core_type = #tpu.core_type<tc>, window_params = [{transform_indices = @transform_0, window_bounds = array<i64: 8, 256>}, {pipeline_mode = #tpu.pipeline_mode<synchronous>, transform_indices = @transform_1, window_bounds = array<i64: 256, 256>}, {pipeline_mode = #tpu.pipeline_mode<synchronous>, transform_indices = @transform_2, window_bounds = array<i64: 256, 256>}, {transform_indices = @transform_3, window_bounds = array<i64: 8, 256>}]} {
    %c0 = arith.constant 0 : index
    %c0_0 = arith.constant 0 : index
    %0 = vector.load %arg1[%c0, %c0_0] : memref<8x256xf32, #tpu.memory_space<vmem>>, vector<8x256xf32>
    %1 = arith.truncf %0 : vector<8x256xf32> to vector<8x256xbf16>
    %c0_1 = arith.constant 0 : index
    %c0_2 = arith.constant 0 : index
    %2 = vector.load %arg2[%c0_1, %c0_2] : memref<256x256xbf16, #tpu.memory_space<vmem>>, vector<256x256xbf16>
    %cst = arith.constant dense<0.000000e+00> : vector<8x256xf32>
    %3 = tpu.matmul %1, %2, %cst {dimension_numbers = #tpu.dot_dimension_numbers<[1], [0], [0], [1], [0, 0, 1, 1], [], []>} : vector<8x256xbf16>, vector<256x256xbf16>, vector<8x256xf32> -> vector<8x256xf32>
    %cst_3 = arith.constant 0.000000e+00 : f32
    %4 = vector.broadcast %cst_3 : f32 to vector<8x256xf32>
    %5 = arith.maximumf %3, %4 : vector<8x256xf32>
    %6 = arith.truncf %5 : vector<8x256xf32> to vector<8x256xbf16>
    %c0_4 = arith.constant 0 : index
    %c0_5 = arith.constant 0 : index
    %7 = vector.load %arg3[%c0_4, %c0_5] : memref<256x256xbf16, #tpu.memory_space<vmem>>, vector<256x256xbf16>
    %cst_6 = arith.constant dense<0.000000e+00> : vector<8x256xf32>
    %8 = tpu.matmul %6, %7, %cst_6 {dimension_numbers = #tpu.dot_dimension_numbers<[1], [0], [0], [1], [0, 0, 1, 1], [], []>} : vector<8x256xbf16>, vector<256x256xbf16>, vector<8x256xf32> -> vector<8x256xf32>
    %9 = arith.addf %8, %0 : vector<8x256xf32>
    %cst_7 = arith.constant dense<0.000000e+00> : vector<8xf32>
    %10 = vector.multi_reduction <add>, %9, %cst_7 [1] : vector<8x256xf32> to vector<8xf32>
    %11 = vector.shape_cast %10 : vector<8xf32> to vector<8x1xf32>
    %cst_8 = arith.constant 2.560000e+02 : f32
    %12 = vector.broadcast %cst_8 : f32 to vector<8x1xf32>
    %13 = arith.divf %11, %12 : vector<8x1xf32>
    %14 = vector.broadcast %13 : vector<8x1xf32> to vector<8x256xf32>
    %15 = arith.subf %9, %14 : vector<8x256xf32>
    %16 = arith.mulf %15, %15 : vector<8x256xf32>
    %cst_9 = arith.constant dense<0.000000e+00> : vector<8xf32>
    %17 = vector.multi_reduction <add>, %16, %cst_9 [1] : vector<8x256xf32> to vector<8xf32>
    %18 = vector.shape_cast %17 : vector<8xf32> to vector<8x1xf32>
    %cst_10 = arith.constant 2.560000e+02 : f32
    %19 = vector.broadcast %cst_10 : f32 to vector<8x1xf32>
    %20 = arith.divf %18, %19 : vector<8x1xf32>
    %cst_11 = arith.constant 9.99999974E-6 : f32
    %21 = vector.broadcast %cst_11 : f32 to vector<8x1xf32>
    %22 = arith.addf %20, %21 : vector<8x1xf32>
    %23 = math.rsqrt %22 : vector<8x1xf32>
    %24 = vector.broadcast %23 : vector<8x1xf32> to vector<8x256xf32>
    %25 = arith.mulf %15, %24 : vector<8x256xf32>
    %c0_12 = arith.constant 0 : index
    %c0_13 = arith.constant 0 : index
    %26 = vector.load %arg4[%c0_12, %c0_13] : memref<8x256xf32, #tpu.memory_space<vmem>>, vector<8x256xf32>
    tpu.vector_store %arg4[%c0_12, %c0_13], %25 {strides = array<i32>} : memref<8x256xf32, #tpu.memory_space<vmem>>, vector<8x256xf32>,
    return
  }
  func.func @transform_0(%arg0: i32) -> (i32, i32) {
    %c0_i32 = arith.constant 0 : i32
    %c0_i32_0 = arith.constant 0 : i32
    return %arg0, %c0_i32 : i32, i32
  }
  func.func @transform_1(%arg0: i32) -> (i32, i32) {
    %c0_i32 = arith.constant 0 : i32
    %c0_i32_0 = arith.constant 0 : i32
    %c0_i32_1 = arith.constant 0 : i32
    return %c0_i32, %c0_i32_0 : i32, i32
  }
  func.func @transform_2(%arg0: i32) -> (i32, i32) {
    %c0_i32 = arith.constant 0 : i32
    %c0_i32_0 = arith.constant 0 : i32
    %c0_i32_1 = arith.constant 0 : i32
    return %c0_i32, %c0_i32_0 : i32, i32
  }
  func.func @transform_3(%arg0: i32) -> (i32, i32) {
    %c0_i32 = arith.constant 0 : i32
    %c0_i32_0 = arith.constant 0 : i32
    return %arg0, %c0_i32 : i32, i32
  }
}

</mosaic_0001>

<bundles_post_ra>
// kernel: poswise_ffn.1
= control target key start
LH: loop header
LB: loop body
LE: loop exit
PB: predicated region body
PF: predicated region fallthrough
CT: control target
= control target key end

     0   :  { %8 = vsyncpa [#allocation3], 0  ;;  %s1717_s0 = inlined_call_operand.vmem [shape: f32[16,256], index: 0, kind: input, shape index: {}]   ;;  %s1718_s1 = inlined_call_operand.vmem [shape: bf16[256,256], index: 1, kind: input, shape index: {}]   ;;  %s1719_s2 = inlined_call_operand.vmem [shape: bf16[256,256], index: 2, kind: input, shape index: {}]   ;;  %s1720_s3 = inlined_call_operand.hbm [shape: f32[16,256], index: 3, kind: output, shape index: {}]  }
   0x1   :  { %10 = vsyncpa [#allocation3 + $0x1], 0  ;;  %s1238_s12 = smov 0   ;;  %s1240_s13 = smov 0  }
   0x2   :  { %s1242_s14 = smov 0   ;;  %s1244_s15 = smov 0  }
   0x3 LB: > { %s1259_s16 = sadd.s32 4294967295, %s1215_s15   ;;  %s775_s17 = sadd.s32 4294967294, %s1215_s15   ;;  %s1215_s15 = sphi %s1244_s15, %s1726_s15   ;;  %s1211_s14 = sphi %s1242_s14, %s1725_s14   ;;  %s1207_s13 = sphi %s1240_s13, %s1724_s13   ;;  %s1203_s12 = sphi %s1238_s12, %s1723_s12  }
   0x4   : > { %s1263_s18 = sadd.s32 1, %s1215_s15   ;;  %s91_s19 = sadd.s32 1, %s1211_s14 }
   0x5   : > { %s88_s20 = ssub.s32 %s1215_s15, %s1263_s18  ;;  %p101_p0 = scmp.ne.s32.totalorder %s1211_s14, %s1207_s13 }
   0x6   : > { %p89_p1 = scmp.eq.s32.totalorder %s88_s20, 0  ;;  %p102_p2 = scmp.eq.s32.totalorder %s1259_s16, 1 }
   0x7   : > { %p107_p3 = scmp.ne.s32.totalorder %s1207_s13, %s1203_s12  ;;  %p108_p4 = scmp.eq.s32.totalorder %s775_s17, 1 }
   0x8   : > { %s1274_s21 = scalar_select %p89_p1, %s1211_s14, %s91_s19  }
   0x9   : > { %p1276_p5 = por %p102_p2, %p101_p0  ;;  %p1280_p6 = por %p108_p4, %p107_p3 }
   0xa   : > { %p778_p7 = scmp.ge.s32.totalorder %s1215_s15, 1  ;;  %p140_p8 = scmp.lt.s32.totalorder %s1215_s15, 3 }
   0xc   : > { %p141_p9 = pnand %p778_p7, %p140_p8 }
   0xd   : > { %p164_p10 = scmp.lt.s32.totalorder (!%p141_p9), %s1259_s16, 1  ;;  %s161_s7 = sand.u32 (!%p141_p9), 1, %s1207_s13  }
   0xe   : > { %144 = sbr.rel (%p141_p9) target bundleno = 598 (0x256), region = 32  ;;  %s779_s8 = sshll.u32 (!%p141_p9), %s161_s7, 4 }
   0xf   : > { %s163_s17 = scalar_lea.vmem (!%p141_p9), [#allocation2], %s779_s8  ;;  %s1173_s28 = scalar_lea.hbm (!%p141_p9), %s1720_s3, 32 }
  0x10   : > { %s713_s19 = sshll.u32 (!%p141_p9), %s163_s17, 4  ;;  %s714_s19 = int_to_ptr.vmem [resolvable:$true] %s713_s19 }
  0x13   : > { %v840_v0 = vld [vmem:[%s1718_s1 + $0x70] sm:$0xf]  ;;  %v1059_v1 = vld [vmem:[%s1718_s1 + $0x74] sm:$0xf0]  ;;  %v1058_v5 = vld [vmem:[%s1718_s1 + $0x74] sm:$0xf] }
  0x14   : > { %v904_v2 = vld [vmem:[%s1718_s1 + $0xf0] sm:$0xf]  ;;  %v841_v3 = vor.u32 %v1059_v1, %v840_v0  ;;  %v1075_v4 = vld [vmem:[%s1718_s1 + $0xf4] sm:$0xf0]  ;;  %v842_v6 = vld [vmem:[%s1718_s1 + $0x78] sm:$0xf0] }
  0x15   : > { %v905_v7 = vor.u32 %v1075_v4, %v904_v2  ;;  %v845_v8 = vor.u32 %v1058_v5, %v842_v6  ;;  %v1074_v9 = vld [vmem:[%s1718_s1 + $0xf4] sm:$0xf]  ;;  %v906_v10 = vld [vmem:[%s1718_s1 + $0xf8] sm:$0xf0]  ;;  %v832_v11 = vld [vmem:[%s1718_s1 + $0x60] sm:$0xf] }
  0x16   : > { %365 = vmatpush.bf16.msra.mxu0 %v841_v3  ;;  %v909_v12 = vor.u32 %v1074_v9, %v906_v10  ;;  %v1057_v13 = vld [vmem:[%s1718_s1 + $0x64] sm:$0xf0]  ;;  %v896_v14 = vld [vmem:[%s1718_s1 + $0xe0] sm:$0xf]  ;;  %v1056_v18 = vld [vmem:[%s1718_s1 + $0x64] sm:$0xf] }
  0x17   : > { %v1073_v15 = vld [vmem:[%s1718_s1 + $0xe4] sm:$0xf0]  ;;  %378 = vmatpush.bf16.msra.mxu1 %v905_v7  ;;  %391 = vmatpush.bf16.msra.mxu2 %v845_v8  ;;  %v833_v16 = vor.u32 %v1057_v13, %v832_v11  ;;  %v834_v19 = vld [vmem:[%s1718_s1 + $0x68] sm:$0xf0]  ;;  %v1072_v20 = vld [vmem:[%s1718_s1 + $0xe4] sm:$0xf] }
  0x18   : > { %v897_v17 = vor.u32 %v1073_v15, %v896_v14  ;;  %404 = vmatpush.bf16.msra.mxu3 %v909_v12  ;;  %v837_v21 = vor.u32 %v1056_v18, %v834_v19  ;;  %v898_v22 = vld [vmem:[%s1718_s1 + $0xe8] sm:$0xf0]  ;;  %v824_v23 = vld [vmem:[%s1718_s1 + $0x50] sm:$0xf]  ;;  %v1055_v24 = vld [vmem:[%s1718_s1 + $0x54] sm:$0xf0] }
  0x19   : > { %v901_v25 = vor.u32 %v1072_v20, %v898_v22  ;;  %v888_v26 = vld [vmem:[%s1718_s1 + $0xd0] sm:$0xf]  ;;  %v1071_v27 = vld [vmem:[%s1718_s1 + $0xd4] sm:$0xf0]  ;;  %v1054_v28 = vld [vmem:[%s1718_s1 + $0x54] sm:$0xf]  ;;  %v825_v29 = vor.u32 %v1055_v24, %v824_v23 }
  0x1a   : > { %366 = vmatpush.bf16.msra.mxu0 %v833_v16  ;;  %v826_v30 = vld [vmem:[%s1718_s1 + $0x58] sm:$0xf0]  ;;  %v1070_v31 = vld [vmem:[%s1718_s1 + $0xd4] sm:$0xf]  ;;  %v889_v33 = vor.u32 %v1071_v27, %v888_v26  ;;  %v816_v35 = vld [vmem:[%s1718_s1 + $0x40] sm:$0xf] }
  0x1b   : > { %v890_v32 = vld [vmem:[%s1718_s1 + $0xd8] sm:$0xf0]  ;;  %379 = vmatpush.bf16.msra.mxu1 %v897_v17  ;;  %392 = vmatpush.bf16.msra.mxu2 %v837_v21  ;;  %v829_v34 = vor.u32 %v1054_v28, %v826_v30  ;;  %v1053_v36 = vld [vmem:[%s1718_s1 + $0x44] sm:$0xf0]  ;;  %v880_v37 = vld [vmem:[%s1718_s1 + $0xc0] sm:$0xf] }
  0x1c   : > { %405 = vmatpush.bf16.msra.mxu3 %v901_v25  ;;  %v893_v38 = vor.u32 %v1070_v31, %v890_v32  ;;  %v1069_v39 = vld [vmem:[%s1718_s1 + $0xc4] sm:$0xf0]  ;;  %v1052_v40 = vld [vmem:[%s1718_s1 + $0x44] sm:$0xf]  ;;  %v818_v41 = vld [vmem:[%s1718_s1 + $0x48] sm:$0xf0]  ;;  %v817_v44 = vor.u32 %v1053_v36, %v816_v35 }
  0x1d   : > { %v1068_v42 = vld [vmem:[%s1718_s1 + $0xc4] sm:$0xf]  ;;  %v882_v43 = vld [vmem:[%s1718_s1 + $0xc8] sm:$0xf0]  ;;  %v881_v45 = vor.u32 %v1069_v39, %v880_v37  ;;  %v821_v46 = vor.u32 %v1052_v40, %v818_v41  ;;  %v808_v47 = vld [vmem:[%s1718_s1 + $0x30] sm:$0xf] }
  0x1e   : > { %367 = vmatpush.bf16.msra.mxu0 %v825_v29  ;;  %v1051_v48 = vld [vmem:[%s1718_s1 + $0x34] sm:$0xf0]  ;;  %v872_v49 = vld [vmem:[%s1718_s1 + $0xb0] sm:$0xf]  ;;  %v885_v50 = vor.u32 %v1068_v42, %v882_v43  ;;  %v1050_v52 = vld [vmem:[%s1718_s1 + $0x34] sm:$0xf] }
  0x1f   : > { %380 = vmatpush.bf16.msra.mxu1 %v889_v33  ;;  %393 = vmatpush.bf16.msra.mxu2 %v829_v34  ;;  %v1067_v51 = vld [vmem:[%s1718_s1 + $0xb4] sm:$0xf0]  ;;  %v810_v53 = vld [vmem:[%s1718_s1 + $0x38] sm:$0xf0]  ;;  %v1066_v54 = vld [vmem:[%s1718_s1 + $0xb4] sm:$0xf]  ;;  %v809_v56 = vor.u32 %v1051_v48, %v808_v47 }
  0x20   : > { %406 = vmatpush.bf16.msra.mxu3 %v893_v38  ;;  %v874_v55 = vld [vmem:[%s1718_s1 + $0xb8] sm:$0xf0]  ;;  %v873_v57 = vor.u32 %v1067_v51, %v872_v49  ;;  %v813_v58 = vor.u32 %v1050_v52, %v810_v53  ;;  %v800_v59 = vld [vmem:[%s1718_s1 + $0x20] sm:$0xf]  ;;  %v1049_v60 = vld [vmem:[%s1718_s1 + $0x24] sm:$0xf0] }
  0x21   : > { %v864_v61 = vld [vmem:[%s1718_s1 + $0xa0] sm:$0xf]  ;;  %v877_v62 = vor.u32 %v1066_v54, %v874_v55  ;;  %v1065_v63 = vld [vmem:[%s1718_s1 + $0xa4] sm:$0xf0]  ;;  %v1048_v0 = vld [vmem:[%s1718_s1 + $0x24] sm:$0xf]  ;;  %v801_v4 = vor.u32 %v1049_v60, %v800_v59 }
  0x22   : > { %368 = vmatpush.bf16.msra.mxu0 %v817_v44  ;;  %v802_v1 = vld [vmem:[%s1718_s1 + $0x28] sm:$0xf0]  ;;  %v1064_v2 = vld [vmem:[%s1718_s1 + $0xa4] sm:$0xf]  ;;  %v792_v5 = vld [vmem:[%s1718_s1 + $0x10] sm:$0xf]  ;;  %v865_v6 = vor.u32 %v1065_v63, %v864_v61 }
  0x23   : > { %381 = vmatpush.bf16.msra.mxu1 %v881_v45  ;;  %394 = vmatpush.bf16.msra.mxu2 %v821_v46  ;;  %v866_v3 = vld [vmem:[%s1718_s1 + $0xa8] sm:$0xf0]  ;;  %v805_v7 = vor.u32 %v1048_v0, %v802_v1  ;;  %v1047_v8 = vld [vmem:[%s1718_s1 + $0x14] sm:$0xf0]  ;;  %v856_v9 = vld [vmem:[%s1718_s1 + $0x90] sm:$0xf] }
  0x24   : > { %407 = vmatpush.bf16.msra.mxu3 %v885_v50  ;;  %v1063_v10 = vld [vmem:[%s1718_s1 + $0x94] sm:$0xf0]  ;;  %v869_v11 = vor.u32 %v1064_v2, %v866_v3  ;;  %v1046_v12 = vld [vmem:[%s1718_s1 + $0x14] sm:$0xf]  ;;  %v794_v13 = vld [vmem:[%s1718_s1 + $0x18] sm:$0xf0]  ;;  %v793_v16 = vor.u32 %v1047_v8, %v792_v5 }
  0x25   : > { %v1062_v14 = vld [vmem:[%s1718_s1 + $0x94] sm:$0xf]  ;;  %v858_v15 = vld [vmem:[%s1718_s1 + $0x98] sm:$0xf0]  ;;  %v784_v17 = vld [vmem:[%s1718_s1] sm:$0xf]  ;;  %v857_v19 = vor.u32 %v1063_v10, %v856_v9  ;;  %v797_v20 = vor.u32 %v1046_v12, %v794_v13 }
  0x26   : > { %369 = vmatpush.bf16.msra.mxu0 %v809_v56  ;;  %v1045_v18 = vld [vmem:[%s1718_s1 + $0x4] sm:$0xf0]  ;;  %s165_s5 = scalar_select %p164_p10, %s1259_s16, 1  ;;  %v848_v21 = vld [vmem:[%s1718_s1 + $0x80] sm:$0xf]  ;;  %v861_v24 = vor.u32 %v1062_v14, %v858_v15 }
  0x27   : > { %382 = vmatpush.bf16.msra.mxu1 %v873_v57  ;;  %395 = vmatpush.bf16.msra.mxu2 %v813_v58  ;;  %v1061_v22 = vld [vmem:[%s1718_s1 + $0x84] sm:$0xf0]  ;;  %v1044_v23 = vld [vmem:[%s1718_s1 + $0x4] sm:$0xf]  ;;  %v786_v25 = vld [vmem:[%s1718_s1 + $0x8] sm:$0xf0]  ;;  %v785_v30 = vor.u32 %v1045_v18, %v784_v17 }
  0x28   : > { %408 = vmatpush.bf16.msra.mxu3 %v877_v62  ;;  %v1060_v26 = vld [vmem:[%s1718_s1 + $0x84] sm:$0xf]  ;;  %s1043_s25 = sshll.u32 %s165_s5, 4  ;;  %v850_v27 = vld [vmem:[%s1718_s1 + $0x88] sm:$0xf0]  ;;  %v849_v34 = vor.u32 %v1061_v22, %v848_v21  ;;  %v789_v35 = vor.u32 %v1044_v23, %v786_v25  ;;  %s1108_s5 = sshll.u32 %s1259_s16, 4 }
  0x29   : > { %s168_s30 = scalar_lea.vmem %s1717_s0, %s1043_s25  ;;  %v968_v28 = vld [vmem:[%s1719_s2 + $0x70] sm:$0xf]  ;;  %v1091_v29 = vld [vmem:[%s1719_s2 + $0x74] sm:$0xf0]  ;;  %v1090_v32 = vld [vmem:[%s1719_s2 + $0x74] sm:$0xf]  ;;  %v853_v37 = vor.u32 %v1060_v26, %v850_v27  ;;  %s711_s11 = scalar_lea.hbm %s1720_s3, %s1108_s5 }
  0x2a   : > { %370 = vmatpush.bf16.msra.mxu0 %v801_v4  ;;  %v1489_v31 = vld [vmem:[%s168_s30] sm:$0xff]  ;;  %v970_v33 = vld [vmem:[%s1719_s2 + $0x78] sm:$0xf0]  ;;  %v1497_v36 = vld [vmem:[%s168_s30 + $0x8] sm:$0xff]  ;;  %v969_v38 = vor.u32 %v1091_v29, %v968_v28  ;;  %s715_s20 = sshll.u32 %s711_s11, 4  ;;  %s700_s16 = scalar_lea.sflag [#allocation3], %s161_s7  ;;  %s716_s20 = int_to_ptr.hbm [resolvable:$true] %s715_s20 }
  0x2b   : > { %383 = vmatpush.bf16.msra.mxu1 %v865_v6  ;;  %396 = vmatpush.bf16.msra.mxu2 %v805_v7  ;;  %v960_v39 = vld [vmem:[%s1719_s2 + $0x60] sm:$0xf]  ;;  %v1032_v40 = vld [vmem:[%s1719_s2 + $0xf0] sm:$0xf]  ;;  %v1107_v41 = vld [vmem:[%s1719_s2 + $0xf4] sm:$0xf0]  ;;  %v171_v42 = vpack.c.bf16 %v1489_v31, %v1489_v31  ;;  %v973_v43 = vor.u32 %v1090_v32, %v970_v33  ;;  %v172_v47 = vpack.c.bf16 %v1497_v36, %v1497_v36 }
  0x2c   : > { %409 = vmatpush.bf16.msra.mxu3 %v869_v11  ;;  %v1089_v44 = vld [vmem:[%s1719_s2 + $0x64] sm:$0xf0]  ;;  %v1106_v45 = vld [vmem:[%s1719_s2 + $0xf4] sm:$0xf]  ;;  %v1034_v46 = vld [vmem:[%s1719_s2 + $0xf8] sm:$0xf0]  ;;  %v1033_v50 = vor.u32 %v1107_v41, %v1032_v40 }
  0x2d   : > { %v1088_v48 = vld [vmem:[%s1719_s2 + $0x64] sm:$0xf]  ;;  %v962_v49 = vld [vmem:[%s1719_s2 + $0x68] sm:$0xf0]  ;;  %v961_v51 = vor.u32 %v1089_v44, %v960_v39  ;;  %v1037_v52 = vor.u32 %v1106_v45, %v1034_v46  ;;  %v952_v53 = vld [vmem:[%s1719_s2 + $0x50] sm:$0xf] }
  0x2e   : > { %371 = vmatpush.bf16.msra.mxu0 %v793_v16  ;;  %v1024_v54 = vld [vmem:[%s1719_s2 + $0xe0] sm:$0xf]  ;;  %v1105_v55 = vld [vmem:[%s1719_s2 + $0xe4] sm:$0xf0]  ;;  %v965_v56 = vor.u32 %v1088_v48, %v962_v49  ;;  %v1087_v57 = vld [vmem:[%s1719_s2 + $0x54] sm:$0xf0] }
  0x2f   : > { %384 = vmatpush.bf16.msra.mxu1 %v857_v19  ;;  %397 = vmatpush.bf16.msra.mxu2 %v797_v20  ;;  %v1104_v58 = vld [vmem:[%s1719_s2 + $0xe4] sm:$0xf]  ;;  %v1026_v59 = vld [vmem:[%s1719_s2 + $0xe8] sm:$0xf0]  ;;  %v1086_v60 = vld [vmem:[%s1719_s2 + $0x54] sm:$0xf]  ;;  %v1025_v62 = vor.u32 %v1105_v55, %v1024_v54  ;;  %v953_v63 = vor.u32 %v1087_v57, %v952_v53 }
  0x30   : > { %410 = vmatpush.bf16.msra.mxu3 %v861_v24  ;;  %v954_v61 = vld [vmem:[%s1719_s2 + $0x58] sm:$0xf0]  ;;  %v1029_v0 = vor.u32 %v1104_v58, %v1026_v59  ;;  %v944_v1 = vld [vmem:[%s1719_s2 + $0x40] sm:$0xf]  ;;  %v1016_v2 = vld [vmem:[%s1719_s2 + $0xd0] sm:$0xf] }
  0x31   : > { %v1103_v3 = vld [vmem:[%s1719_s2 + $0xd4] sm:$0xf0]  ;;  %v957_v4 = vor.u32 %v1086_v60, %v954_v61  ;;  %v1085_v5 = vld [vmem:[%s1719_s2 + $0x44] sm:$0xf0]  ;;  %v1102_v6 = vld [vmem:[%s1719_s2 + $0xd4] sm:$0xf] }
  0x32   : > { %372 = vmatpush.bf16.msra.mxu0 %v785_v30  ;;  %v1018_v7 = vld [vmem:[%s1719_s2 + $0xd8] sm:$0xf0]  ;;  %v1084_v8 = vld [vmem:[%s1719_s2 + $0x44] sm:$0xf]  ;;  %v946_v9 = vld [vmem:[%s1719_s2 + $0x48] sm:$0xf0]  ;;  %v1017_v10 = vor.u32 %v1103_v3, %v1016_v2  ;;  %v945_v11 = vor.u32 %v1085_v5, %v944_v1 }
  0x33   : > { %385 = vmatpush.bf16.msra.mxu1 %v849_v34  ;;  %398 = vmatpush.bf16.msra.mxu2 %v789_v35  ;;  %v1021_v12 = vor.u32 %v1102_v6, %v1018_v7  ;;  %v936_v13 = vld [vmem:[%s1719_s2 + $0x30] sm:$0xf]  ;;  %v1008_v14 = vld [vmem:[%s1719_s2 + $0xc0] sm:$0xf]  ;;  %v1101_v15 = vld [vmem:[%s1719_s2 + $0xc4] sm:$0xf0]  ;;  %v949_v16 = vor.u32 %v1084_v8, %v946_v9 }
  0x34   : > { %411 = vmatpush.bf16.msra.mxu3 %v853_v37  ;;  %v1083_v17 = vld [vmem:[%s1719_s2 + $0x34] sm:$0xf0]  ;;  %v1100_v18 = vld [vmem:[%s1719_s2 + $0xc4] sm:$0xf]  ;;  %v1010_v19 = vld [vmem:[%s1719_s2 + $0xc8] sm:$0xf0]  ;;  %v1009_v22 = vor.u32 %v1101_v15, %v1008_v14 }
  0x35   : > { %373 = vmatmul.bf16.vlgmr.msra.gmra.mxu0 %v171_v42  ;;  %v1082_v20 = vld [vmem:[%s1719_s2 + $0x34] sm:$0xf]  ;;  %v938_v21 = vld [vmem:[%s1719_s2 + $0x38] sm:$0xf0]  ;;  %v937_v23 = vor.u32 %v1083_v17, %v936_v13  ;;  %v1013_v24 = vor.u32 %v1100_v18, %v1010_v19  ;;  %v928_v25 = vld [vmem:[%s1719_s2 + $0x20] sm:$0xf] }
  0x36   : > { %613 = vmatpush.bf16.msrb.mxu0 %v969_v38  ;;  %386 = vmatmul.bf16.vlgmr.msra.gmra.mxu1 %v172_v47  ;;  %v1000_v26 = vld [vmem:[%s1719_s2 + $0xb0] sm:$0xf]  ;;  %v1099_v27 = vld [vmem:[%s1719_s2 + $0xb4] sm:$0xf0]  ;;  %v941_v28 = vor.u32 %v1082_v20, %v938_v21  ;;  %v1081_v29 = vld [vmem:[%s1719_s2 + $0x24] sm:$0xf0] }
  0x37   : > { %639 = vmatpush.bf16.msrb.mxu2 %v973_v43  ;;  %412 = vmatmul.bf16.vlgmr.msra.gmra.mxu3 %v172_v47  ;;  %v1098_v30 = vld [vmem:[%s1719_s2 + $0xb4] sm:$0xf]  ;;  %v1002_v32 = vld [vmem:[%s1719_s2 + $0xb8] sm:$0xf0]  ;;  %v1080_v33 = vld [vmem:[%s1719_s2 + $0x24] sm:$0xf]  ;;  %v1001_v35 = vor.u32 %v1099_v27, %v1000_v26  ;;  %v929_v37 = vor.u32 %v1081_v29, %v928_v25 }
  0x38   : > { %399 = vmatmul.bf16.vlgmr.msra.gmra.mxu2 %v171_v42  ;;  %626 = vmatpush.bf16.msrb.mxu1 %v1033_v50  ;;  %v930_v34 = vld [vmem:[%s1719_s2 + $0x28] sm:$0xf0]  ;;  %v1005_v38 = vor.u32 %v1098_v30, %v1002_v32  ;;  %v920_v40 = vld [vmem:[%s1719_s2 + $0x10] sm:$0xf]  ;;  %v1079_v41 = vld [vmem:[%s1719_s2 + $0x14] sm:$0xf0] }
  0x39   : > { %652 = vmatpush.bf16.msrb.mxu3 %v1037_v52  ;;  %v933_v39 = vor.u32 %v1080_v33, %v930_v34  ;;  %v1078_v42 = vld [vmem:[%s1719_s2 + $0x14] sm:$0xf]  ;;  %v921_v43 = vor.u32 %v1079_v41, %v920_v40  ;;  %v922_v44 = vld [vmem:[%s1719_s2 + $0x18] sm:$0xf0]  ;;  %v992_v46 = vld [vmem:[%s1719_s2 + $0xa0] sm:$0xf] }
  0x3a   : > { %614 = vmatpush.bf16.msrb.mxu0 %v961_v51  ;;  %v925_v45 = vor.u32 %v1078_v42, %v922_v44  ;;  %v1097_v47 = vld [vmem:[%s1719_s2 + $0xa4] sm:$0xf0]  ;;  %v1096_v48 = vld [vmem:[%s1719_s2 + $0xa4] sm:$0xf]  ;;  %v994_v50 = vld [vmem:[%s1719_s2 + $0xa8] sm:$0xf0] }
  0x3b   : > { %640 = vmatpush.bf16.msrb.mxu2 %v965_v56  ;;  %v993_v49 = vor.u32 %v1097_v47, %v992_v46  ;;  %v997_v51 = vor.u32 %v1096_v48, %v994_v50  ;;  %v912_v52 = vld [vmem:[%s1719_s2] sm:$0xf]  ;;  %v1077_v53 = vld [vmem:[%s1719_s2 + $0x4] sm:$0xf0]  ;;  %v1076_v54 = vld [vmem:[%s1719_s2 + $0x4] sm:$0xf] }
  0x3c   : > { %627 = vmatpush.bf16.msrb.mxu1 %v1025_v62  ;;  %v913_v55 = vor.u32 %v1077_v53, %v912_v52  ;;  %v914_v56 = vld [vmem:[%s1719_s2 + $0x8] sm:$0xf0]  ;;  %v984_v58 = vld [vmem:[%s1719_s2 + $0x90] sm:$0xf]  ;;  %v1095_v59 = vld [vmem:[%s1719_s2 + $0x94] sm:$0xf0] }
  0x3d   : > { %653 = vmatpush.bf16.msrb.mxu3 %v1029_v0  ;;  %v917_v57 = vor.u32 %v1076_v54, %v914_v56  ;;  %v1094_v60 = vld [vmem:[%s1719_s2 + $0x94] sm:$0xf]  ;;  %v985_v61 = vor.u32 %v1095_v59, %v984_v58  ;;  %v986_v62 = vld [vmem:[%s1719_s2 + $0x98] sm:$0xf0]  ;;  %v976_v0 = vld [vmem:[%s1719_s2 + $0x80] sm:$0xf] }
  0x3e   : > { %615 = vmatpush.bf16.msrb.mxu0 %v953_v63  ;;  %v989_v63 = vor.u32 %v1094_v60, %v986_v62  ;;  %v1093_v1 = vld [vmem:[%s1719_s2 + $0x84] sm:$0xf0]  ;;  %v1092_v2 = vld [vmem:[%s1719_s2 + $0x84] sm:$0xf]  ;;  %v1217_v34 = vmov 256.0   ;;  %s1167_s24 = sshra.s32 %s716_s20, 4  ;;  %s1168_s24 = int_to_ptr.hbm [resolvable:$true] %s1167_s24 }
  0x3f   : > { %641 = vmatpush.bf16.msrb.mxu2 %v957_v4  ;;  %v977_v3 = vor.u32 %v1093_v1, %v976_v0  ;;  %v978_v4 = vld [vmem:[%s1719_s2 + $0x88] sm:$0xf0]  ;;  %1149 = vrcp.f32 %v1217_v34  ;;  %s1169_s25 = scalar_lea.hbm %s1168_s24, 16  ;;  %p1174_p0 = scmp.lt.s32.totalorder %s1168_s24, %s1720_s3 }
  0x40   : > { %628 = vmatpush.bf16.msrb.mxu1 %v1017_v10  ;;  %v981_v5 = vor.u32 %v1092_v2, %v978_v4  ;;  %p1170_p11 = scmp.ne.s32.totalorder %s1168_s24, %s1169_s25  ;;  %p1175_p1 = scmp.lt.s32.totalorder %s1173_s28, %s1169_s25 }
  0x41   : > { %654 = vmatpush.bf16.msrb.mxu3 %v1021_v12 }
  0x42   : > { %616 = vmatpush.bf16.msrb.mxu0 %v945_v11  ;;  %p1171_p12 = pnand %p1170_p11, %p1276_p5  ;;  %p1176_p2 = por %p1175_p1, %p1174_p0 }
  0x43   : > { %642 = vmatpush.bf16.msrb.mxu2 %v949_v16 }
  0x44   : > { %629 = vmatpush.bf16.msrb.mxu1 %v1009_v22  ;;  %p1172_p13 = pneg %p1171_p12 }
  0x45   : > { %655 = vmatpush.bf16.msrb.mxu3 %v1013_v24 }
  0x46   : > { %617 = vmatpush.bf16.msrb.mxu0 %v937_v23  ;;  %p1177_p3 = pnand %p1176_p2, %p1172_p13 }
  0x47   : > { %643 = vmatpush.bf16.msrb.mxu2 %v941_v28 }
  0x48   : > { %630 = vmatpush.bf16.msrb.mxu1 %v1001_v35  ;;  %v1150_v35 = vpop.eup %1149 }
  0x49   : > { %656 = vmatpush.bf16.msrb.mxu3 %v1005_v38  ;;  %vm673_vm0 = vweird.f32 %v1150_v35 }
  0x4a   : > { %618 = vmatpush.bf16.msrb.mxu0 %v929_v37  ;;  %v669_v37 = vmul.f32 256.0, %v1150_v35 }
  0x4b   : > { %644 = vmatpush.bf16.msrb.mxu2 %v933_v39 }
  0x4c   : > { %631 = vmatpush.bf16.msrb.mxu1 %v993_v49  ;;  %v670_v38 = vsub.f32 1.0, %v669_v37 }
  0x4d   : > { %657 = vmatpush.bf16.msrb.mxu3 %v997_v51 }
  0x4e   : > { %619 = vmatpush.bf16.msrb.mxu0 %v921_v43  ;;  %v671_v39 = vmul.f32 %v1150_v35, %v670_v38 }
  0x4f   : > { %645 = vmatpush.bf16.msrb.mxu2 %v925_v45 }
  0x50   : > { %632 = vmatpush.bf16.msrb.mxu1 %v985_v61  ;;  %v672_v40 = vadd.f32 %v1150_v35, %v671_v39 }
  0x51   : > { %658 = vmatpush.bf16.msrb.mxu3 %v989_v63 }
  0x52   : > { %620 = vmatpush.bf16.msrb.mxu0 %v913_v55 }
  0x53   : > { %646 = vmatpush.bf16.msrb.mxu2 %v917_v57 }
  0x54   : > { %633 = vmatpush.bf16.msrb.mxu1 %v977_v3 }
  0x55   : > { %659 = vmatpush.bf16.msrb.mxu3 %v981_v5 }
  0xb2   : > { %v374_v6 = vpop.f32.mrf.mxu0 }
  0xb3   : > { %v387_v7 = vpop.f32.mrf.mxu1 }
  0xb4   : > { %v388_v8 = vadd.f32 %v387_v7, %v374_v6 }
  0xb6   : > { %v417_v9 = vmax.f32 %v388_v8, 0.0 }
  0xb8   : > { %v419_v10 = vpack.c.bf16 %v417_v9, %v417_v9 }
  0xba   : > { %v413_v12 = vpop.f32.mrf.mxu3  ;;  %621 = vmatmul.bf16.vlgmr.msrb.gmra.mxu0 %v419_v10  ;;  %647 = vmatmul.bf16.vlgmr.msrb.gmra.mxu2 %v419_v10  ;;  %v376_v13 = vpop.f32.mrf.mxu0 }
  0xbb   : > { %v400_v11 = vpop.f32.mrf.mxu2  ;;  %v389_v15 = vpop.f32.mrf.mxu1 }
  0xbc   : > { %v414_v14 = vadd.f32 %v413_v12, %v400_v11 }
  0xbe   : > { %v418_v16 = vmax.f32 %v414_v14, 0.0 }
  0xc0   : > { %v420_v17 = vpack.c.bf16 %v418_v16, %v418_v16 }
  0xc2   : > { %634 = vmatmul.bf16.vlgmr.msrb.gmra.mxu1 %v420_v17  ;;  %660 = vmatmul.bf16.vlgmr.msrb.gmra.mxu3 %v420_v17  ;;  %v415_v19 = vpop.f32.mrf.mxu3 }
  0xc3   : > { %v402_v18 = vpop.f32.mrf.mxu2 }
 0x137   : > { %v622_v20 = vpop.f32.mrf.mxu0 }
 0x138   : > { %v623_v24 = vadd.f32 %v622_v20, %v1489_v31  ;;  %v674_v31 = vsel %vm673_vm0, %v1150_v35, %v672_v40 }
 0x13d   : > { %v648_v21 = vpop.f32.mrf.mxu2 }
 0x13e   : > { %v649_v25 = vadd.f32 %v648_v21, %v1497_v36 }
 0x13f   : > { %v635_v22 = vpop.f32.mrf.mxu1  ;;  %v624_v23 = vpop.f32.mrf.mxu0 }
 0x140   : > { %v636_v27 = vadd.f32 %v635_v22, %v623_v24 }
 0x145   : > { %v661_v26 = vpop.f32.mrf.mxu3  ;;  %v650_v29 = vpop.f32.mrf.mxu2 }
 0x146   : > { %v662_v28 = vadd.f32 %v661_v26, %v649_v25 }
 0x147   : > { %v637_v30 = vpop.f32.mrf.mxu1 }
 0x148   : > { %v665_v32 = vadd.f32 %v662_v28, %v636_v27 }
 0x14a   : > { %666 = vadd.xlane.f32.xlu0 %v665_v32 }
 0x14d   : > { %v663_v33 = vpop.f32.mrf.mxu3 }
 0x1bd   : > { %v667_v41 = vpop.xlane.xlu0 %666 }
 0x1be   : > { %v675_v36 = vmul.f32 %v674_v31, %v667_v41 }
 0x1c0   : > { %v676_v42 = vsub.f32 %v636_v27, %v675_v36  ;;  %v677_v43 = vsub.f32 %v662_v28, %v675_v36 }
 0x1c2   : > { %v678_v44 = vmul.f32 %v676_v42, %v676_v42  ;;  %v679_v45 = vmul.f32 %v677_v43, %v677_v43 }
 0x1c4   : > { %v680_v46 = vadd.f32 %v679_v45, %v678_v44 }
 0x1c6   : > { %681 = vadd.xlane.f32.xlu0 %v680_v46 }
 0x239   : > { %v682_v47 = vpop.xlane.xlu0 %681 }
 0x23a   : > { %v683_v48 = vmul.f32 %v682_v47, %v674_v31 }
 0x23c   : > { %v684_v49 = vadd.f32 1e-05, %v683_v48 }
 0x23e   : > { %1151 = vrsqrt.f32 %v684_v49  ;;  %vm691_vm2 = vweird.f32 %v684_v49 }
 0x244   : > { %v1152_v50 = vpop.eup %1151 }
 0x245   : > { %v686_v51 = vmul.f32 %v1152_v50, %v684_v49  ;;  %vm692_vm1 = vweird.f32 %v1152_v50 }
 0x246   : > { %vm693_vm3 = vmor %vm691_vm2, %vm692_vm1 }
 0x247   : > { %v687_v52 = vmul.f32 %v1152_v50, %v686_v51 }
 0x249   : > { %v688_v53 = vmul.f32 0.5, %v687_v52 }
 0x24b   : > { %v689_v54 = vsub.f32 1.5, %v688_v53 }
 0x24d   : > { %v690_v55 = vmul.f32 %v1152_v50, %v689_v54 }
 0x24f   : > { %v694_v56 = vsel %vm693_vm3, %v1152_v50, %v690_v55 }
 0x250   : > { %v695_v57 = vmul.f32 %v694_v56, %v676_v42  ;;  %v696_v58 = vmul.f32 %v694_v56, %v677_v43 }
 0x252   : > { %697 = vst [vmem:[%s163_s17] sm:$0xff] %v695_v57 }
 0x253   : > { %698 = vst [vmem:[%s163_s17 + $0x8] sm:$0xff] %v696_v58 }
 0x254   : > { %1180 = shalt.err (!%p1177_p3)
}
 0x255   : > { %1109 = dma.vmem_to_hbm [thread:$0]  (%p1276_p5), %s714_s19, 256, %s716_s20, %s700_s16  }
 0x256 PF: > { %p1115_p4 = scmp.ge.s32.totalorder %s1215_s15, 2  ;;  %s727_s4 = sand.u32 1, %s1203_s12  }
 0x257   : > { %s728_s6 = scalar_lea.sflag [#allocation3], %s727_s4 }
 0x258   : > { %p1112_p7 = pnand %p1115_p4, %p1280_p6 }
 0x25a   : > { %p1113_p8 = pneg %p1112_p7 }
 0x25c   : > { %1198 = dma.done.wait (%p1113_p8), %s728_s6, 256  }
 0x25d   : > { %1200 = vsyncadd (%p1113_p8), %s728_s6, 4294967040  ;;  %p13_p9 = scmp.ge.s32.totalorder %s1263_s18, 4   ;;  %s1723_s12 = smov %s1207_s13 }
 0x25e   : > { %s1724_s13 = smov %s1211_s14  ;;  %s1725_s14 = smov %s1274_s21 }
 0x25f   : > { %s1726_s15 = smov %s1263_s18  ;;  %15 = sbr.rel (!%p13_p9) target bundleno = 3 (0x3), region = 67 }
 0x264   :  { %734 = vsyncpa [#allocation3], 1 }
 0x265   :  { %736 = vsyncpa [#allocation3 + $0x1], 1 }

</bundles_post_ra>
